<compile_context>
chip_gen: v7x
topology: tpu7x:2x2x1
jax: 0.10.0
libtpu: 0.0.40
codegen_flags: <defaults>
</compile_context>

<pallas_src>
import jax
import jax.numpy as jnp
from jax.experimental import pallas as pl
from jax.experimental.pallas import tpu as pltpu


def greedy_kernel(w_ref, seq_ref, negsize_ref):
    # w_ref:        (V, BB, U) f32 weights of this batch block, step-major.
    # seq_ref:      (BB, V)    i32 selected u index per arrival step.
    # negsize_ref:  (BB, 1)    f32 -(total matched weight).
    V, BB, U = w_ref.shape

    # Loop-invariant iotas hoisted out of the v loop.
    iota_u = jax.lax.broadcasted_iota(jnp.int32, (BB, U), 1)
    u_pos = iota_u > 0
    iota_v = jax.lax.broadcasted_iota(jnp.int32, (BB, V), 1)

    def step(v, carry):
        matched, size, seq = carry
        w = w_ref[v]                                    # dense (BB, U) tile
        # state.get_mask(): matched u OR no edge; skip column (u=0) never masked.
        mask = matched | ((w == 0.0) & u_pos)
        # w[mask] = -1.0 ; selected = argmax(w, dim=1)  (first maximal index)
        wm = jnp.where(mask, -1.0, w)
        mx = jnp.max(wm, axis=1, keepdims=True)                      # (BB, 1)
        sel = jnp.min(jnp.where(wm == mx, iota_u, U), axis=1, keepdims=True)
        # state.update(selected): mark matched u, accumulate matched weight.
        matched = matched | ((iota_u == sel) & u_pos)
        # mx equals the selected edge weight exactly (skip column is 0 and never
        # masked, masked entries are -1 < 0 <= mx) -> no gather/sum reduction.
        size = size + jnp.maximum(mx, 0.0)
        # sequences.append(selected): accumulate in registers, store once later.
        seq = jnp.where(iota_v == v, sel, seq)
        return matched, size, seq

    init = (jnp.zeros((BB, U), jnp.bool_),
            jnp.zeros((BB, 1), jnp.float32),
            jnp.zeros((BB, V), jnp.int32))
    unroll = True if V <= 64 else 8
    _, size, seq = jax.lax.fori_loop(0, V, step, init, unroll=unroll)

    seq_ref[...] = seq                  # single lane-dense (BB, V) store
    negsize_ref[...] = -size            # forward returns -state.size


def greedy_pallas(weights_vbu, batch_block=None):
    """weights_vbu: (v_size, batch, u_size+1) f32, step-major.

    Returns (-size (B,), sequences (B, V)) — the torch forward's
    (-state.size, torch.stack(sequences, 1)) with the trailing None dropped.
    """
    V, B, U = weights_vbu.shape
    if batch_block is None:
        # Two "parallel" batch blocks (second TensorCore on v7x) when the
        # (8, 128) block-divisibility rule allows it; otherwise one block.
        batch_block = B // 2 if (B % 16 == 0) else B
    assert B % batch_block == 0

    seq, negsize = pl.pallas_call(
        greedy_kernel,
        out_shape=(
            jax.ShapeDtypeStruct((B, V), jnp.int32),
            jax.ShapeDtypeStruct((B, 1), jnp.float32),
        ),
        grid_spec=pltpu.PrefetchScalarGridSpec(
            num_scalar_prefetch=0,
            grid=(B // batch_block,),
            in_specs=[pl.BlockSpec((V, batch_block, U), lambda b: (0, b, 0))],
            out_specs=(
                pl.BlockSpec((batch_block, V), lambda b: (b, 0)),
                pl.BlockSpec((batch_block, 1), lambda b: (b, 0)),
            ),
        ),
        compiler_params=pltpu.CompilerParams(
            dimension_semantics=("parallel",)),
    )(weights_vbu)
    return negsize[:, 0], seq


def greedy_ref(weights_vbu):
    """Pure-JAX reference of the torch greedy forward loop (step-major input)."""
    V, B, U = weights_vbu.shape
    iota_u = jnp.arange(U, dtype=jnp.int32)[None, :]

    def step(carry, w):
        matched, size = carry
        mask = matched | ((w == 0.0) & (iota_u > 0))
        wm = jnp.where(mask, -1.0, w)
        mx = jnp.max(wm, axis=1, keepdims=True)
        sel = jnp.min(jnp.where(wm == mx, iota_u, U), axis=1)
        onehot = iota_u == sel[:, None]
        matched = matched | (onehot & (iota_u > 0))
        size = size + jnp.sum(jnp.where(onehot, w, 0.0), axis=1)
        return (matched, size), sel

    init = (jnp.zeros((B, U), jnp.bool_), jnp.zeros((B,), jnp.float32))
    (_, size), seqs = jax.lax.scan(step, init, weights_vbu)
    return -size, jnp.transpose(seqs).astype(jnp.int32)


if __name__ == "__main__":
    # TODO(synk): `problem.make_state` / `opts` are external; a synthetic e-OBM
    # instance (bipartite edge weights with random sparsity, step-major layout)
    # is built here instead.
    B, u_size, v_size = 4, 15, 8
    U = u_size + 1

    key = jax.random.PRNGKey(0)
    kw, ka = jax.random.split(key)
    w = jax.random.uniform(kw, (v_size, B, U), dtype=jnp.float32,
                           minval=0.1, maxval=1.0)
    adj = jax.random.bernoulli(ka, 0.6, (v_size, B, U))
    w = jnp.where(adj, w, 0.0)
    w = w.at[:, :, 0].set(0.0)                       # skip option has weight 0

    neg_size, seqs = jax.block_until_ready(jax.jit(greedy_pallas)(w))
    neg_size_ref, seqs_ref = greedy_ref(w)

    assert seqs.shape == (B, v_size) and neg_size.shape == (B,)
    assert jnp.array_equal(seqs, seqs_ref), (seqs, seqs_ref)
    assert jnp.allclose(neg_size, neg_size_ref, atol=1e-6), (neg_size, neg_size_ref)
    print("KERNEL_OK")
</pallas_src>

<mosaic_0001>
module attributes {stable_mosaic.version = 11 : i64} {
  func.func @greedy_kernel(%arg0: i32, %arg1: memref<8x4x16xf32, #tpu.memory_space<vmem>>, %arg2: memref<4x8xi32, #tpu.memory_space<vmem>>, %arg3: memref<4x1xf32, #tpu.memory_space<vmem>>) attributes {dimension_semantics = [#tpu.dimension_semantics<parallel>], iteration_bounds = array<i64: 1>, scalar_prefetch = 0 : i64, scratch_operands = 0 : i64, tpu.core_type = #tpu.core_type<tc>, window_params = [{transform_indices = @transform_0, window_bounds = array<i64: 8, 4, 16>}, {transform_indices = @transform_1, window_bounds = array<i64: 4, 8>}, {transform_indices = @transform_2, window_bounds = array<i64: 4, 1>}]} {
    %0 = tpu.iota {dimensions = array<i32: 1>} : vector<4x16xi32>
    %c0_i32 = arith.constant 0 : i32
    %1 = vector.broadcast %c0_i32 : i32 to vector<4x16xi32>
    %2 = arith.cmpi sgt, %0, %1 : vector<4x16xi32>
    %3 = tpu.iota {dimensions = array<i32: 1>} : vector<4x8xi32>
    %false = arith.constant false
    %4 = vector.broadcast %false : i1 to vector<4x16xi1>
    %cst = arith.constant 0.000000e+00 : f32
    %5 = vector.broadcast %cst : f32 to vector<4x1xf32>
    %c0_i32_0 = arith.constant 0 : i32
    %6 = vector.broadcast %c0_i32_0 : i32 to vector<4x8xi32>
    %c0_i32_1 = arith.constant 0 : i32
    %7 = arith.index_cast %c0_i32_1 : i32 to index
    %c0 = arith.constant 0 : index
    %c0_2 = arith.constant 0 : index
    %8 = vector.load %arg1[%7, %c0, %c0_2] : memref<8x4x16xf32, #tpu.memory_space<vmem>>, vector<1x4x16xf32>
    %9 = vector.shape_cast %8 : vector<1x4x16xf32> to vector<4x16xf32>
    %cst_3 = arith.constant 0.000000e+00 : f32
    %10 = vector.broadcast %cst_3 : f32 to vector<4x16xf32>
    %11 = arith.cmpf oeq, %9, %10 : vector<4x16xf32>
    %12 = arith.andi %11, %2 : vector<4x16xi1>
    %13 = arith.ori %4, %12 : vector<4x16xi1>
    %cst_4 = arith.constant -1.000000e+00 : f32
    %14 = vector.broadcast %cst_4 : f32 to vector<4x16xf32>
    %15 = arith.select %13, %14, %9 : vector<4x16xi1>, vector<4x16xf32>
    %cst_5 = arith.constant dense<0xFF800000> : vector<4xf32>
    %16 = vector.multi_reduction <maximumf>, %15, %cst_5 [1] : vector<4x16xf32> to vector<4xf32>
    %17 = vector.shape_cast %16 : vector<4xf32> to vector<4x1xf32>
    %18 = vector.broadcast %17 : vector<4x1xf32> to vector<4x16xf32>
    %19 = arith.cmpf oeq, %15, %18 : vector<4x16xf32>
    %c16_i32 = arith.constant 16 : i32
    %20 = vector.broadcast %c16_i32 : i32 to vector<4x16xi32>
    %21 = arith.select %19, %0, %20 : vector<4x16xi1>, vector<4x16xi32>
    %cst_6 = arith.constant dense<2147483647> : vector<4xi32>
    %22 = vector.multi_reduction <minsi>, %21, %cst_6 [1] : vector<4x16xi32> to vector<4xi32>
    %23 = vector.shape_cast %22 : vector<4xi32> to vector<4x1xi32>
    %24 = vector.broadcast %23 : vector<4x1xi32> to vector<4x16xi32>
    %25 = arith.cmpi eq, %0, %24 : vector<4x16xi32>
    %26 = arith.andi %25, %2 : vector<4x16xi1>
    %27 = arith.ori %4, %26 : vector<4x16xi1>
    %cst_7 = arith.constant 0.000000e+00 : f32
    %28 = vector.broadcast %cst_7 : f32 to vector<4x1xf32>
    %29 = arith.maximumf %17, %28 : vector<4x1xf32>
    %30 = arith.addf %5, %29 : vector<4x1xf32>
    %31 = vector.broadcast %c0_i32_1 : i32 to vector<4x8xi32>
    %32 = arith.cmpi eq, %3, %31 : vector<4x8xi32>
    %33 = vector.shape_cast %23 : vector<4x1xi32> to vector<4x1xi32>
    %34 = vector.broadcast %33 : vector<4x1xi32> to vector<4x8xi32>
    %35 = arith.select %32, %34, %6 : vector<4x8xi1>, vector<4x8xi32>
    %c1_i32 = arith.constant 1 : i32
    %36 = arith.index_cast %c1_i32 : i32 to index
    %c0_8 = arith.constant 0 : index
    %c0_9 = arith.constant 0 : index
    %37 = vector.load %arg1[%36, %c0_8, %c0_9] : memref<8x4x16xf32, #tpu.memory_space<vmem>>, vector<1x4x16xf32>
    %38 = vector.shape_cast %37 : vector<1x4x16xf32> to vector<4x16xf32>
    %cst_10 = arith.constant 0.000000e+00 : f32
    %39 = vector.broadcast %cst_10 : f32 to vector<4x16xf32>
    %40 = arith.cmpf oeq, %38, %39 : vector<4x16xf32>
    %41 = arith.andi %40, %2 : vector<4x16xi1>
    %42 = arith.ori %27, %41 : vector<4x16xi1>
    %cst_11 = arith.constant -1.000000e+00 : f32
    %43 = vector.broadcast %cst_11 : f32 to vector<4x16xf32>
    %44 = arith.select %42, %43, %38 : vector<4x16xi1>, vector<4x16xf32>
    %cst_12 = arith.constant dense<0xFF800000> : vector<4xf32>
    %45 = vector.multi_reduction <maximumf>, %44, %cst_12 [1] : vector<4x16xf32> to vector<4xf32>
    %46 = vector.shape_cast %45 : vector<4xf32> to vector<4x1xf32>
    %47 = vector.broadcast %46 : vector<4x1xf32> to vector<4x16xf32>
    %48 = arith.cmpf oeq, %44, %47 : vector<4x16xf32>
    %c16_i32_13 = arith.constant 16 : i32
    %49 = vector.broadcast %c16_i32_13 : i32 to vector<4x16xi32>
    %50 = arith.select %48, %0, %49 : vector<4x16xi1>, vector<4x16xi32>
    %cst_14 = arith.constant dense<2147483647> : vector<4xi32>
    %51 = vector.multi_reduction <minsi>, %50, %cst_14 [1] : vector<4x16xi32> to vector<4xi32>
    %52 = vector.shape_cast %51 : vector<4xi32> to vector<4x1xi32>
    %53 = vector.broadcast %52 : vector<4x1xi32> to vector<4x16xi32>
    %54 = arith.cmpi eq, %0, %53 : vector<4x16xi32>
    %55 = arith.andi %54, %2 : vector<4x16xi1>
    %56 = arith.ori %27, %55 : vector<4x16xi1>
    %cst_15 = arith.constant 0.000000e+00 : f32
    %57 = vector.broadcast %cst_15 : f32 to vector<4x1xf32>
    %58 = arith.maximumf %46, %57 : vector<4x1xf32>
    %59 = arith.addf %30, %58 : vector<4x1xf32>
    %60 = vector.broadcast %c1_i32 : i32 to vector<4x8xi32>
    %61 = arith.cmpi eq, %3, %60 : vector<4x8xi32>
    %62 = vector.shape_cast %52 : vector<4x1xi32> to vector<4x1xi32>
    %63 = vector.broadcast %62 : vector<4x1xi32> to vector<4x8xi32>
    %64 = arith.select %61, %63, %35 : vector<4x8xi1>, vector<4x8xi32>
    %c2_i32 = arith.constant 2 : i32
    %65 = arith.index_cast %c2_i32 : i32 to index
    %c0_16 = arith.constant 0 : index
    %c0_17 = arith.constant 0 : index
    %66 = vector.load %arg1[%65, %c0_16, %c0_17] : memref<8x4x16xf32, #tpu.memory_space<vmem>>, vector<1x4x16xf32>
    %67 = vector.shape_cast %66 : vector<1x4x16xf32> to vector<4x16xf32>
    %cst_18 = arith.constant 0.000000e+00 : f32
    %68 = vector.broadcast %cst_18 : f32 to vector<4x16xf32>
    %69 = arith.cmpf oeq, %67, %68 : vector<4x16xf32>
    %70 = arith.andi %69, %2 : vector<4x16xi1>
    %71 = arith.ori %56, %70 : vector<4x16xi1>
    %cst_19 = arith.constant -1.000000e+00 : f32
    %72 = vector.broadcast %cst_19 : f32 to vector<4x16xf32>
    %73 = arith.select %71, %72, %67 : vector<4x16xi1>, vector<4x16xf32>
    %cst_20 = arith.constant dense<0xFF800000> : vector<4xf32>
    %74 = vector.multi_reduction <maximumf>, %73, %cst_20 [1] : vector<4x16xf32> to vector<4xf32>
    %75 = vector.shape_cast %74 : vector<4xf32> to vector<4x1xf32>
    %76 = vector.broadcast %75 : vector<4x1xf32> to vector<4x16xf32>
    %77 = arith.cmpf oeq, %73, %76 : vector<4x16xf32>
    %c16_i32_21 = arith.constant 16 : i32
    %78 = vector.broadcast %c16_i32_21 : i32 to vector<4x16xi32>
    %79 = arith.select %77, %0, %78 : vector<4x16xi1>, vector<4x16xi32>
    %cst_22 = arith.constant dense<2147483647> : vector<4xi32>
    %80 = vector.multi_reduction <minsi>, %79, %cst_22 [1] : vector<4x16xi32> to vector<4xi32>
    %81 = vector.shape_cast %80 : vector<4xi32> to vector<4x1xi32>
    %82 = vector.broadcast %81 : vector<4x1xi32> to vector<4x16xi32>
    %83 = arith.cmpi eq, %0, %82 : vector<4x16xi32>
    %84 = arith.andi %83, %2 : vector<4x16xi1>
    %85 = arith.ori %56, %84 : vector<4x16xi1>
    %cst_23 = arith.constant 0.000000e+00 : f32
    %86 = vector.broadcast %cst_23 : f32 to vector<4x1xf32>
    %87 = arith.maximumf %75, %86 : vector<4x1xf32>
    %88 = arith.addf %59, %87 : vector<4x1xf32>
    %89 = vector.broadcast %c2_i32 : i32 to vector<4x8xi32>
    %90 = arith.cmpi eq, %3, %89 : vector<4x8xi32>
    %91 = vector.shape_cast %81 : vector<4x1xi32> to vector<4x1xi32>
    %92 = vector.broadcast %91 : vector<4x1xi32> to vector<4x8xi32>
    %93 = arith.select %90, %92, %64 : vector<4x8xi1>, vector<4x8xi32>
    %c3_i32 = arith.constant 3 : i32
    %94 = arith.index_cast %c3_i32 : i32 to index
    %c0_24 = arith.constant 0 : index
    %c0_25 = arith.constant 0 : index
    %95 = vector.load %arg1[%94, %c0_24, %c0_25] : memref<8x4x16xf32, #tpu.memory_space<vmem>>, vector<1x4x16xf32>
    %96 = vector.shape_cast %95 : vector<1x4x16xf32> to vector<4x16xf32>
    %cst_26 = arith.constant 0.000000e+00 : f32
    %97 = vector.broadcast %cst_26 : f32 to vector<4x16xf32>
    %98 = arith.cmpf oeq, %96, %97 : vector<4x16xf32>
    %99 = arith.andi %98, %2 : vector<4x16xi1>
    %100 = arith.ori %85, %99 : vector<4x16xi1>
    %cst_27 = arith.constant -1.000000e+00 : f32
    %101 = vector.broadcast %cst_27 : f32 to vector<4x16xf32>
    %102 = arith.select %100, %101, %96 : vector<4x16xi1>, vector<4x16xf32>
    %cst_28 = arith.constant dense<0xFF800000> : vector<4xf32>
    %103 = vector.multi_reduction <maximumf>, %102, %cst_28 [1] : vector<4x16xf32> to vector<4xf32>
    %104 = vector.shape_cast %103 : vector<4xf32> to vector<4x1xf32>
    %105 = vector.broadcast %104 : vector<4x1xf32> to vector<4x16xf32>
    %106 = arith.cmpf oeq, %102, %105 : vector<4x16xf32>
    %c16_i32_29 = arith.constant 16 : i32
    %107 = vector.broadcast %c16_i32_29 : i32 to vector<4x16xi32>
    %108 = arith.select %106, %0, %107 : vector<4x16xi1>, vector<4x16xi32>
    %cst_30 = arith.constant dense<2147483647> : vector<4xi32>
    %109 = vector.multi_reduction <minsi>, %108, %cst_30 [1] : vector<4x16xi32> to vector<4xi32>
    %110 = vector.shape_cast %109 : vector<4xi32> to vector<4x1xi32>
    %111 = vector.broadcast %110 : vector<4x1xi32> to vector<4x16xi32>
    %112 = arith.cmpi eq, %0, %111 : vector<4x16xi32>
    %113 = arith.andi %112, %2 : vector<4x16xi1>
    %114 = arith.ori %85, %113 : vector<4x16xi1>
    %cst_31 = arith.constant 0.000000e+00 : f32
    %115 = vector.broadcast %cst_31 : f32 to vector<4x1xf32>
    %116 = arith.maximumf %104, %115 : vector<4x1xf32>
    %117 = arith.addf %88, %116 : vector<4x1xf32>
    %118 = vector.broadcast %c3_i32 : i32 to vector<4x8xi32>
    %119 = arith.cmpi eq, %3, %118 : vector<4x8xi32>
    %120 = vector.shape_cast %110 : vector<4x1xi32> to vector<4x1xi32>
    %121 = vector.broadcast %120 : vector<4x1xi32> to vector<4x8xi32>
    %122 = arith.select %119, %121, %93 : vector<4x8xi1>, vector<4x8xi32>
    %c4_i32 = arith.constant 4 : i32
    %123 = arith.index_cast %c4_i32 : i32 to index
    %c0_32 = arith.constant 0 : index
    %c0_33 = arith.constant 0 : index
    %124 = vector.load %arg1[%123, %c0_32, %c0_33] : memref<8x4x16xf32, #tpu.memory_space<vmem>>, vector<1x4x16xf32>
    %125 = vector.shape_cast %124 : vector<1x4x16xf32> to vector<4x16xf32>
    %cst_34 = arith.constant 0.000000e+00 : f32
    %126 = vector.broadcast %cst_34 : f32 to vector<4x16xf32>
    %127 = arith.cmpf oeq, %125, %126 : vector<4x16xf32>
    %128 = arith.andi %127, %2 : vector<4x16xi1>
    %129 = arith.ori %114, %128 : vector<4x16xi1>
    %cst_35 = arith.constant -1.000000e+00 : f32
    %130 = vector.broadcast %cst_35 : f32 to vector<4x16xf32>
    %131 = arith.select %129, %130, %125 : vector<4x16xi1>, vector<4x16xf32>
    %cst_36 = arith.constant dense<0xFF800000> : vector<4xf32>
    %132 = vector.multi_reduction <maximumf>, %131, %cst_36 [1] : vector<4x16xf32> to vector<4xf32>
    %133 = vector.shape_cast %132 : vector<4xf32> to vector<4x1xf32>
    %134 = vector.broadcast %133 : vector<4x1xf32> to vector<4x16xf32>
    %135 = arith.cmpf oeq, %131, %134 : vector<4x16xf32>
    %c16_i32_37 = arith.constant 16 : i32
    %136 = vector.broadcast %c16_i32_37 : i32 to vector<4x16xi32>
    %137 = arith.select %135, %0, %136 : vector<4x16xi1>, vector<4x16xi32>
    %cst_38 = arith.constant dense<2147483647> : vector<4xi32>
    %138 = vector.multi_reduction <minsi>, %137, %cst_38 [1] : vector<4x16xi32> to vector<4xi32>
    %139 = vector.shape_cast %138 : vector<4xi32> to vector<4x1xi32>
    %140 = vector.broadcast %139 : vector<4x1xi32> to vector<4x16xi32>
    %141 = arith.cmpi eq, %0, %140 : vector<4x16xi32>
    %142 = arith.andi %141, %2 : vector<4x16xi1>
    %143 = arith.ori %114, %142 : vector<4x16xi1>
    %cst_39 = arith.constant 0.000000e+00 : f32
    %144 = vector.broadcast %cst_39 : f32 to vector<4x1xf32>
    %145 = arith.maximumf %133, %144 : vector<4x1xf32>
    %146 = arith.addf %117, %145 : vector<4x1xf32>
    %147 = vector.broadcast %c4_i32 : i32 to vector<4x8xi32>
    %148 = arith.cmpi eq, %3, %147 : vector<4x8xi32>
    %149 = vector.shape_cast %139 : vector<4x1xi32> to vector<4x1xi32>
    %150 = vector.broadcast %149 : vector<4x1xi32> to vector<4x8xi32>
    %151 = arith.select %148, %150, %122 : vector<4x8xi1>, vector<4x8xi32>
    %c5_i32 = arith.constant 5 : i32
    %152 = arith.index_cast %c5_i32 : i32 to index
    %c0_40 = arith.constant 0 : index
    %c0_41 = arith.constant 0 : index
    %153 = vector.load %arg1[%152, %c0_40, %c0_41] : memref<8x4x16xf32, #tpu.memory_space<vmem>>, vector<1x4x16xf32>
    %154 = vector.shape_cast %153 : vector<1x4x16xf32> to vector<4x16xf32>
    %cst_42 = arith.constant 0.000000e+00 : f32
    %155 = vector.broadcast %cst_42 : f32 to vector<4x16xf32>
    %156 = arith.cmpf oeq, %154, %155 : vector<4x16xf32>
    %157 = arith.andi %156, %2 : vector<4x16xi1>
    %158 = arith.ori %143, %157 : vector<4x16xi1>
    %cst_43 = arith.constant -1.000000e+00 : f32
    %159 = vector.broadcast %cst_43 : f32 to vector<4x16xf32>
    %160 = arith.select %158, %159, %154 : vector<4x16xi1>, vector<4x16xf32>
    %cst_44 = arith.constant dense<0xFF800000> : vector<4xf32>
    %161 = vector.multi_reduction <maximumf>, %160, %cst_44 [1] : vector<4x16xf32> to vector<4xf32>
    %162 = vector.shape_cast %161 : vector<4xf32> to vector<4x1xf32>
    %163 = vector.broadcast %162 : vector<4x1xf32> to vector<4x16xf32>
    %164 = arith.cmpf oeq, %160, %163 : vector<4x16xf32>
    %c16_i32_45 = arith.constant 16 : i32
    %165 = vector.broadcast %c16_i32_45 : i32 to vector<4x16xi32>
    %166 = arith.select %164, %0, %165 : vector<4x16xi1>, vector<4x16xi32>
    %cst_46 = arith.constant dense<2147483647> : vector<4xi32>
    %167 = vector.multi_reduction <minsi>, %166, %cst_46 [1] : vector<4x16xi32> to vector<4xi32>
    %168 = vector.shape_cast %167 : vector<4xi32> to vector<4x1xi32>
    %169 = vector.broadcast %168 : vector<4x1xi32> to vector<4x16xi32>
    %170 = arith.cmpi eq, %0, %169 : vector<4x16xi32>
    %171 = arith.andi %170, %2 : vector<4x16xi1>
    %172 = arith.ori %143, %171 : vector<4x16xi1>
    %cst_47 = arith.constant 0.000000e+00 : f32
    %173 = vector.broadcast %cst_47 : f32 to vector<4x1xf32>
    %174 = arith.maximumf %162, %173 : vector<4x1xf32>
    %175 = arith.addf %146, %174 : vector<4x1xf32>
    %176 = vector.broadcast %c5_i32 : i32 to vector<4x8xi32>
    %177 = arith.cmpi eq, %3, %176 : vector<4x8xi32>
    %178 = vector.shape_cast %168 : vector<4x1xi32> to vector<4x1xi32>
    %179 = vector.broadcast %178 : vector<4x1xi32> to vector<4x8xi32>
    %180 = arith.select %177, %179, %151 : vector<4x8xi1>, vector<4x8xi32>
    %c6_i32 = arith.constant 6 : i32
    %181 = arith.index_cast %c6_i32 : i32 to index
    %c0_48 = arith.constant 0 : index
    %c0_49 = arith.constant 0 : index
    %182 = vector.load %arg1[%181, %c0_48, %c0_49] : memref<8x4x16xf32, #tpu.memory_space<vmem>>, vector<1x4x16xf32>
    %183 = vector.shape_cast %182 : vector<1x4x16xf32> to vector<4x16xf32>
    %cst_50 = arith.constant 0.000000e+00 : f32
    %184 = vector.broadcast %cst_50 : f32 to vector<4x16xf32>
    %185 = arith.cmpf oeq, %183, %184 : vector<4x16xf32>
    %186 = arith.andi %185, %2 : vector<4x16xi1>
    %187 = arith.ori %172, %186 : vector<4x16xi1>
    %cst_51 = arith.constant -1.000000e+00 : f32
    %188 = vector.broadcast %cst_51 : f32 to vector<4x16xf32>
    %189 = arith.select %187, %188, %183 : vector<4x16xi1>, vector<4x16xf32>
    %cst_52 = arith.constant dense<0xFF800000> : vector<4xf32>
    %190 = vector.multi_reduction <maximumf>, %189, %cst_52 [1] : vector<4x16xf32> to vector<4xf32>
    %191 = vector.shape_cast %190 : vector<4xf32> to vector<4x1xf32>
    %192 = vector.broadcast %191 : vector<4x1xf32> to vector<4x16xf32>
    %193 = arith.cmpf oeq, %189, %192 : vector<4x16xf32>
    %c16_i32_53 = arith.constant 16 : i32
    %194 = vector.broadcast %c16_i32_53 : i32 to vector<4x16xi32>
    %195 = arith.select %193, %0, %194 : vector<4x16xi1>, vector<4x16xi32>
    %cst_54 = arith.constant dense<2147483647> : vector<4xi32>
    %196 = vector.multi_reduction <minsi>, %195, %cst_54 [1] : vector<4x16xi32> to vector<4xi32>
    %197 = vector.shape_cast %196 : vector<4xi32> to vector<4x1xi32>
    %198 = vector.broadcast %197 : vector<4x1xi32> to vector<4x16xi32>
    %199 = arith.cmpi eq, %0, %198 : vector<4x16xi32>
    %200 = arith.andi %199, %2 : vector<4x16xi1>
    %201 = arith.ori %172, %200 : vector<4x16xi1>
    %cst_55 = arith.constant 0.000000e+00 : f32
    %202 = vector.broadcast %cst_55 : f32 to vector<4x1xf32>
    %203 = arith.maximumf %191, %202 : vector<4x1xf32>
    %204 = arith.addf %175, %203 : vector<4x1xf32>
    %205 = vector.broadcast %c6_i32 : i32 to vector<4x8xi32>
    %206 = arith.cmpi eq, %3, %205 : vector<4x8xi32>
    %207 = vector.shape_cast %197 : vector<4x1xi32> to vector<4x1xi32>
    %208 = vector.broadcast %207 : vector<4x1xi32> to vector<4x8xi32>
    %209 = arith.select %206, %208, %180 : vector<4x8xi1>, vector<4x8xi32>
    %c7_i32 = arith.constant 7 : i32
    %210 = arith.index_cast %c7_i32 : i32 to index
    %c0_56 = arith.constant 0 : index
    %c0_57 = arith.constant 0 : index
    %211 = vector.load %arg1[%210, %c0_56, %c0_57] : memref<8x4x16xf32, #tpu.memory_space<vmem>>, vector<1x4x16xf32>
    %212 = vector.shape_cast %211 : vector<1x4x16xf32> to vector<4x16xf32>
    %cst_58 = arith.constant 0.000000e+00 : f32
    %213 = vector.broadcast %cst_58 : f32 to vector<4x16xf32>
    %214 = arith.cmpf oeq, %212, %213 : vector<4x16xf32>
    %215 = arith.andi %214, %2 : vector<4x16xi1>
    %216 = arith.ori %201, %215 : vector<4x16xi1>
    %cst_59 = arith.constant -1.000000e+00 : f32
    %217 = vector.broadcast %cst_59 : f32 to vector<4x16xf32>
    %218 = arith.select %216, %217, %212 : vector<4x16xi1>, vector<4x16xf32>
    %cst_60 = arith.constant dense<0xFF800000> : vector<4xf32>
    %219 = vector.multi_reduction <maximumf>, %218, %cst_60 [1] : vector<4x16xf32> to vector<4xf32>
    %220 = vector.shape_cast %219 : vector<4xf32> to vector<4x1xf32>
    %221 = vector.broadcast %220 : vector<4x1xf32> to vector<4x16xf32>
    %222 = arith.cmpf oeq, %218, %221 : vector<4x16xf32>
    %c16_i32_61 = arith.constant 16 : i32
    %223 = vector.broadcast %c16_i32_61 : i32 to vector<4x16xi32>
    %224 = arith.select %222, %0, %223 : vector<4x16xi1>, vector<4x16xi32>
    %cst_62 = arith.constant dense<2147483647> : vector<4xi32>
    %225 = vector.multi_reduction <minsi>, %224, %cst_62 [1] : vector<4x16xi32> to vector<4xi32>
    %226 = vector.shape_cast %225 : vector<4xi32> to vector<4x1xi32>
    %227 = vector.broadcast %226 : vector<4x1xi32> to vector<4x16xi32>
    %228 = arith.cmpi eq, %0, %227 : vector<4x16xi32>
    %229 = arith.andi %228, %2 : vector<4x16xi1>
    %230 = arith.ori %201, %229 : vector<4x16xi1>
    %cst_63 = arith.constant 0.000000e+00 : f32
    %231 = vector.broadcast %cst_63 : f32 to vector<4x1xf32>
    %232 = arith.maximumf %220, %231 : vector<4x1xf32>
    %233 = arith.addf %204, %232 : vector<4x1xf32>
    %234 = vector.broadcast %c7_i32 : i32 to vector<4x8xi32>
    %235 = arith.cmpi eq, %3, %234 : vector<4x8xi32>
    %236 = vector.shape_cast %226 : vector<4x1xi32> to vector<4x1xi32>
    %237 = vector.broadcast %236 : vector<4x1xi32> to vector<4x8xi32>
    %238 = arith.select %235, %237, %209 : vector<4x8xi1>, vector<4x8xi32>
    %c8_i32 = arith.constant 8 : i32
    %c0_64 = arith.constant 0 : index
    %c0_65 = arith.constant 0 : index
    %239 = vector.load %arg2[%c0_64, %c0_65] : memref<4x8xi32, #tpu.memory_space<vmem>>, vector<4x8xi32>
    tpu.vector_store %arg2[%c0_64, %c0_65], %238 {strides = array<i32>} : memref<4x8xi32, #tpu.memory_space<vmem>>, vector<4x8xi32>,
    %cst_66 = arith.constant 0.000000e+00 : f32
    %240 = vector.broadcast %cst_66 : f32 to vector<4x1xf32>
    %241 = arith.subf %240, %233 : vector<4x1xf32>
    %c0_67 = arith.constant 0 : index
    %c0_68 = arith.constant 0 : index
    %242 = vector.load %arg3[%c0_67, %c0_68] : memref<4x1xf32, #tpu.memory_space<vmem>>, vector<4x1xf32>
    tpu.vector_store %arg3[%c0_67, %c0_68], %241 {strides = array<i32>} : memref<4x1xf32, #tpu.memory_space<vmem>>, vector<4x1xf32>,
    return
  }
  func.func @transform_0(%arg0: i32) -> (i32, i32, i32) {
    %c0_i32 = arith.constant 0 : i32
    %c0_i32_0 = arith.constant 0 : i32
    %c0_i32_1 = arith.constant 0 : i32
    return %c0_i32, %arg0, %c0_i32_0 : i32, i32, i32
  }
  func.func @transform_1(%arg0: i32) -> (i32, i32) {
    %c0_i32 = arith.constant 0 : i32
    %c0_i32_0 = arith.constant 0 : i32
    return %arg0, %c0_i32 : i32, i32
  }
  func.func @transform_2(%arg0: i32) -> (i32, i32) {
    %c0_i32 = arith.constant 0 : i32
    %c0_i32_0 = arith.constant 0 : i32
    return %arg0, %c0_i32 : i32, i32
  }
}

</mosaic_0001>

<bundles_post_ra>
// kernel: greedy_pallas.1
= control target key start
LH: loop header
LB: loop body
LE: loop exit
PB: predicated region body
PF: predicated region fallthrough
CT: control target
= control target key end

     0   :  { %8 = vsyncpa [#allocation3], 0  ;;  %s577_s0 = inlined_call_operand.hbm [shape: f32[8,4,16], index: 0, kind: input, shape index: {}]   ;;  %s578_s1 = inlined_call_operand.hbm [shape: s32[4,8], index: 1, kind: output, shape index: {0}]   ;;  %s579_s2 = inlined_call_operand.vmem [shape: f32[4,1], index: 2, kind: output, shape index: {1}]  }
   0x1   :  { %9 = vsyncpa [#allocation4], 0  ;;  %s363_s9 = smov [#allocation2]   ;;  %s315_s13 = scalar_lea.hbm %s577_s0, 512 }
   0x2   :  { %s15_s10 = sshll.u32 %s363_s9, 4  ;;  %p316_p0 = scmp.ne.s32.totalorder %s577_s0, %s315_s13  ;;  %s16_s10 = int_to_ptr.vmem [resolvable:$true] %s15_s10 }
   0x3   :  { %p319_p1 = scmp.lt.u32.totalorder %s315_s13, %s577_s0 }
   0x5   :  { %p321_p2 = pnand %p319_p1, %p316_p0 }
   0x7   :  { %324 = shalt.err (!%p321_p2)
}
   0x8   :  { %s325_s18 = scalar_lea.vmem %s16_s10, 512  ;;  %p330_p4 = scmp.lt.s32.totalorder %s16_s10, %s16_s10 }
   0x9   :  { %p326_p3 = scmp.ne.s32.totalorder %s16_s10, %s325_s18  ;;  %p331_p5 = scmp.lt.s32.totalorder %s325_s18, %s325_s18 }
   0xb   :  { %p332_p6 = por %p331_p5, %p330_p4 }
   0xd   :  { %p333_p7 = pnand %p332_p6, %p326_p3 }
   0xf   :  { %336 = shalt.err (!%p333_p7)
}
  0x10   :  { %s364_s19 = smov 64   ;;  %s365_s20 = smov 4  }
  0x11   :  { %21 = dma.hbm_to_vmem [thread:$0]  %s577_s0, 512, %s16_s10, [#allocation3], %s364_s19, %s364_s19, %s365_s20  }
  0x12   :  { %359 = dma.done.wait [#allocation3], 512  }
  0x13   :  { %360 = vsyncadd [#allocation3], 4294966784  ;;  %v25_v0 = vlaneseq  ;;  %v28_v2 = vld [vmem:[#allocation2] sm:$0xf]  ;;  %vm32_vm2 = vcmask 125952   ;;  %s366_s24 = smov [#allocation5]  }
  0x14   :  { %vm29_vm1 = vcmp.eq.f32.partialorder %v28_v2, 0.0  ;;  %v60_v15 = vld [vmem:[#allocation2 + $0x4] sm:$0xf]  ;;  %v93_v33 = vld [vmem:[#allocation2 + $0x8] sm:$0xf]  ;;  %s298_s25 = sshll.u32 %s366_s24, 4  ;;  %s299_s25 = int_to_ptr.vmem [resolvable:$true] %s298_s25 }
  0x15   :  { %v394_v1 = vand.u32 127, %v25_v0  ;;  %vm61_vm6 = vcmp.eq.f32.partialorder %v60_v15, 0.0  ;;  %vm94_vm15 = vcmp.eq.f32.partialorder %v93_v33, 0.0  ;;  %v126_v53 = vld [vmem:[#allocation2 + $0xc] sm:$0xf]  ;;  %p342_p9 = scmp.lt.s32.totalorder %s299_s25, %s299_s25 }
  0x17   :  { %vm27_vm0 = vcmp.gt.s32.totalorder %v394_v1, 0  ;;  %vm57_vm13 = vcmp.eq.s32.totalorder %v394_v1, 0  ;;  %vm90_vm14 = vcmp.eq.s32.totalorder %v394_v1, 1 }
  0x18   :  { %vm30_vm3 = vmand %vm29_vm1, %vm27_vm0 }
  0x19   :  { %v31_v3 = vsel %vm30_vm3, -1.0, %v28_v2  ;;  %vm62_vm7 = vmand %vm61_vm6, %vm27_vm0 }
  0x1a   :  { %v33_v4 = vsel %vm32_vm2, %v31_v3, -inf  ;;  %vm95_vm3 = vmand %vm94_vm15, %vm27_vm0 }
  0x1b   :  { %34 = vmax.xlane.f32.xlu0 %v33_v4 }
  0xa8   :  { %v400_v5 = vpop.xlane.xlu0 %34 }
  0xa9   :  { %vm36_vm4 = vcmp.eq.f32.partialorder %v31_v3, %v400_v5 }
  0xaa   :  { %v37_v6 = vsel %vm36_vm4, %v394_v1, 16 }
  0xab   :  { %v38_v7 = vsel %vm32_vm2, %v37_v6, 2147483647 }
  0xac   :  { %v40_v8 = vshra.s32 %v38_v7, 16  ;;  %v39_v10 = vand.u32 65535, %v38_v7 }
  0xae   :  { %v42_v9 = vcvt.s32.f32 %v40_v8  ;;  %v41_v12 = vcvt.s32.f32 %v39_v10  ;;  %v159_v10 = vld [vmem:[#allocation2 + $0x10] sm:$0xf] }
  0xb0   :  { %43 = vmin.xlane.f32.xlu0 %v42_v9 }
 0x13d   :  { %v44_v11 = vpop.xlane.xlu0 %43 }
 0x13e   :  { %vm45_vm5 = vcmp.eq.f32.partialorder %v42_v9, %v44_v11  ;;  %v50_v14 = vcvt.f32.s32 %v44_v11 }
 0x13f   :  { %v46_v13 = vsel %vm45_vm5, %v41_v12, inf }
 0x140   :  { %47 = vmin.xlane.f32.xlu1 %v46_v13  ;;  %v51_v17 = vshll.u32 %v50_v14, 16 }
 0x1cd   :  { %v48_v16 = vpop.xlane.xlu1 %47 }
 0x1ce   :  { %v49_v18 = vcvt.f32.s32 %v48_v16 }
 0x1d0   :  { %v52_v19 = vadd.s32 %v51_v17, %v49_v18 }
 0x1d2   :  { %vm53_vm8 = vcmp.eq.s32.totalorder %v394_v1, %v52_v19  ;;  %v58_v38 = vsel %vm57_vm13, %v52_v19, 0 }
 0x1d3   :  { %vm410_vm9 = vmand %vm53_vm8, %vm27_vm0 }
 0x1d4   :  { %vm63_vm10 = vmor %vm410_vm9, %vm62_vm7 }
 0x1d5   :  { %v64_v21 = vsel %vm63_vm10, -1.0, %v60_v15  ;;  %vm123_vm10 = vcmp.eq.s32.totalorder %v394_v1, 2 }
 0x1d6   :  { %v65_v22 = vsel %vm32_vm2, %v64_v21, -inf }
 0x1d7   :  { %66 = vmax.xlane.f32.xlu1 %v65_v22 }
 0x264   :  { %v417_v23 = vpop.xlane.xlu1 %66 }
 0x265   :  { %vm68_vm11 = vcmp.eq.f32.partialorder %v64_v21, %v417_v23  ;;  %v88_v16 = vmax.f32 %v417_v23, 0.0 }
 0x266   :  { %v69_v24 = vsel %vm68_vm11, %v394_v1, 16  ;;  %vm127_vm11 = vcmp.eq.f32.partialorder %v126_v53, 0.0 }
 0x267   :  { %v70_v25 = vsel %vm32_vm2, %v69_v24, 2147483647  ;;  %vm128_vm13 = vmand %vm127_vm11, %vm27_vm0 }
 0x268   :  { %v72_v26 = vshra.s32 %v70_v25, 16  ;;  %v71_v28 = vand.u32 65535, %v70_v25 }
 0x26a   :  { %v74_v27 = vcvt.s32.f32 %v72_v26  ;;  %v73_v30 = vcvt.s32.f32 %v71_v28 }
 0x26c   :  { %75 = vmin.xlane.f32.xlu0 %v74_v27 }
 0x2f9   :  { %v76_v29 = vpop.xlane.xlu0 %75 }
 0x2fa   :  { %vm77_vm12 = vcmp.eq.f32.partialorder %v74_v27, %v76_v29  ;;  %v82_v32 = vcvt.f32.s32 %v76_v29 }
 0x2fb   :  { %v78_v31 = vsel %vm77_vm12, %v73_v30, inf  ;;  %v192_v30 = vld [vmem:[#allocation2 + $0x14] sm:$0xf] }
 0x2fc   :  { %79 = vmin.xlane.f32.xlu1 %v78_v31  ;;  %v83_v35 = vshll.u32 %v82_v32, 16 }
 0x389   :  { %v80_v34 = vpop.xlane.xlu1 %79 }
 0x38a   :  { %v81_v36 = vcvt.f32.s32 %v80_v34 }
 0x38c   :  { %v84_v37 = vadd.s32 %v83_v35, %v81_v36 }
 0x38e   :  { %vm85_vm1 = vcmp.eq.s32.totalorder %v394_v1, %v84_v37  ;;  %v91_v39 = vsel %vm90_vm14, %v84_v37, %v58_v38 }
 0x38f   :  { %vm429_vm4 = vmand %vm85_vm1, %vm27_vm0 }
 0x390   :  { %vm87_vm5 = vmor %vm410_vm9, %vm429_vm4  ;;  %vm156_vm4 = vcmp.eq.s32.totalorder %v394_v1, 3 }
 0x391   :  { %vm96_vm6 = vmor %vm87_vm5, %vm95_vm3 }
 0x392   :  { %v97_v41 = vsel %vm96_vm6, -1.0, %v93_v33 }
 0x393   :  { %v98_v42 = vsel %vm32_vm2, %v97_v41, -inf }
 0x394   :  { %99 = vmax.xlane.f32.xlu0 %v98_v42 }
 0x421   :  { %v443_v43 = vpop.xlane.xlu0 %99 }
 0x422   :  { %vm101_vm7 = vcmp.eq.f32.partialorder %v97_v41, %v443_v43 }
 0x423   :  { %v102_v44 = vsel %vm101_vm7, %v394_v1, 16 }
 0x424   :  { %v103_v45 = vsel %vm32_vm2, %v102_v44, 2147483647 }
 0x425   :  { %v105_v46 = vshra.s32 %v103_v45, 16  ;;  %v104_v48 = vand.u32 65535, %v103_v45 }
 0x427   :  { %v107_v47 = vcvt.s32.f32 %v105_v46  ;;  %v106_v50 = vcvt.s32.f32 %v104_v48 }
 0x429   :  { %108 = vmin.xlane.f32.xlu1 %v107_v47 }
 0x4b6   :  { %v109_v49 = vpop.xlane.xlu1 %108 }
 0x4b7   :  { %vm110_vm8 = vcmp.eq.f32.partialorder %v107_v47, %v109_v49  ;;  %v115_v52 = vcvt.f32.s32 %v109_v49 }
 0x4b8   :  { %v111_v51 = vsel %vm110_vm8, %v106_v50, inf  ;;  %v225_v50 = vld [vmem:[#allocation2 + $0x18] sm:$0xf] }
 0x4b9   :  { %112 = vmin.xlane.f32.xlu0 %v111_v51  ;;  %v116_v55 = vshll.u32 %v115_v52, 16 }
 0x546   :  { %v113_v54 = vpop.xlane.xlu0 %112 }
 0x547   :  { %v114_v56 = vcvt.f32.s32 %v113_v54 }
 0x549   :  { %v117_v57 = vadd.s32 %v116_v55, %v114_v56 }
 0x54b   :  { %vm118_vm12 = vcmp.eq.s32.totalorder %v394_v1, %v117_v57  ;;  %v124_v58 = vsel %vm123_vm10, %v117_v57, %v91_v39 }
 0x54c   :  { %vm119_vm14 = vmand %vm118_vm12, %vm27_vm0 }
 0x54d   :  { %vm459_vm15 = vmor %vm87_vm5, %vm119_vm14  ;;  %vm160_vm5 = vcmp.eq.f32.partialorder %v159_v10, 0.0  ;;  %vm189_vm14 = vcmp.eq.s32.totalorder %v394_v1, 4 }
 0x54e   :  { %vm129_vm1 = vmor %vm459_vm15, %vm128_vm13 }
 0x54f   :  { %v130_v60 = vsel %vm129_vm1, -1.0, %v126_v53  ;;  %vm161_vm7 = vmand %vm160_vm5, %vm27_vm0  ;;  %vm193_vm1 = vcmp.eq.f32.partialorder %v192_v30, 0.0 }
 0x550   :  { %v131_v61 = vsel %vm32_vm2, %v130_v60, -inf }
 0x551   :  { %132 = vmax.xlane.f32.xlu1 %v131_v61 }
 0x5de   :  { %v466_v62 = vpop.xlane.xlu1 %132 }
 0x5df   :  { %vm134_vm3 = vcmp.eq.f32.partialorder %v130_v60, %v466_v62 }
 0x5e0   :  { %v135_v63 = vsel %vm134_vm3, %v394_v1, 16 }
 0x5e1   :  { %v136_v0 = vsel %vm32_vm2, %v135_v63, 2147483647 }
 0x5e2   :  { %v138_v2 = vshra.s32 %v136_v0, 16  ;;  %v137_v4 = vand.u32 65535, %v136_v0 }
 0x5e4   :  { %v140_v3 = vcvt.s32.f32 %v138_v2  ;;  %v139_v7 = vcvt.s32.f32 %v137_v4 }
 0x5e6   :  { %141 = vmin.xlane.f32.xlu0 %v140_v3 }
 0x673   :  { %v142_v6 = vpop.xlane.xlu0 %141 }
 0x674   :  { %vm143_vm9 = vcmp.eq.f32.partialorder %v140_v3, %v142_v6  ;;  %v148_v9 = vcvt.f32.s32 %v142_v6 }
 0x675   :  { %v144_v8 = vsel %vm143_vm9, %v139_v7, inf  ;;  %vm194_vm9 = vmand %vm193_vm1, %vm27_vm0 }
 0x676   :  { %145 = vmin.xlane.f32.xlu1 %v144_v8  ;;  %v149_v12 = vshll.u32 %v148_v9, 16  ;;  %v258_v8 = vld [vmem:[#allocation2 + $0x1c] sm:$0xf] }
 0x703   :  { %v146_v11 = vpop.xlane.xlu1 %145 }
 0x704   :  { %v147_v13 = vcvt.f32.s32 %v146_v11 }
 0x706   :  { %v150_v14 = vadd.s32 %v149_v12, %v147_v13 }
 0x708   :  { %vm151_vm6 = vcmp.eq.s32.totalorder %v394_v1, %v150_v14  ;;  %v157_v15 = vsel %vm156_vm4, %v150_v14, %v124_v58 }
 0x709   :  { %vm477_vm8 = vmand %vm151_vm6, %vm27_vm0 }
 0x70a   :  { %vm153_vm10 = vmor %vm459_vm15, %vm477_vm8  ;;  %vm222_vm8 = vcmp.eq.s32.totalorder %v394_v1, 5 }
 0x70b   :  { %vm162_vm11 = vmor %vm153_vm10, %vm161_vm7 }
 0x70c   :  { %v163_v17 = vsel %vm162_vm11, -1.0, %v159_v10 }
 0x70d   :  { %v164_v18 = vsel %vm32_vm2, %v163_v17, -inf }
 0x70e   :  { %165 = vmax.xlane.f32.xlu0 %v164_v18  ;;  %v121_v18 = vmax.f32 %v443_v43, 0.0 }
 0x79b   :  { %v491_v19 = vpop.xlane.xlu0 %165 }
 0x79c   :  { %vm167_vm12 = vcmp.eq.f32.partialorder %v163_v17, %v491_v19  ;;  %v55_v17 = vmax.f32 %v400_v5, 0.0 }
 0x79d   :  { %v168_v20 = vsel %vm167_vm12, %v394_v1, 16 }
 0x79e   :  { %v169_v21 = vsel %vm32_vm2, %v168_v20, 2147483647  ;;  %v89_v20 = vadd.f32 %v88_v16, %v55_v17 }
 0x79f   :  { %v171_v22 = vshra.s32 %v169_v21, 16  ;;  %v170_v25 = vand.u32 65535, %v169_v21  ;;  %v154_v21 = vmax.f32 %v466_v62, 0.0 }
 0x7a1   :  { %v173_v24 = vcvt.s32.f32 %v171_v22  ;;  %v172_v27 = vcvt.s32.f32 %v170_v25  ;;  %v122_v22 = vadd.f32 %v121_v18, %v89_v20 }
 0x7a3   :  { %174 = vmin.xlane.f32.xlu1 %v173_v24  ;;  %v155_v25 = vadd.f32 %v154_v21, %v122_v22 }
 0x830   :  { %v175_v26 = vpop.xlane.xlu1 %174 }
 0x831   :  { %vm176_vm13 = vcmp.eq.f32.partialorder %v173_v24, %v175_v26  ;;  %v181_v29 = vcvt.f32.s32 %v175_v26  ;;  %v187_v24 = vmax.f32 %v491_v19, 0.0 }
 0x832   :  { %v177_v28 = vsel %vm176_vm13, %v172_v27, inf }
 0x833   :  { %178 = vmin.xlane.f32.xlu0 %v177_v28  ;;  %v182_v32 = vshll.u32 %v181_v29, 16  ;;  %v188_v27 = vadd.f32 %v187_v24, %v155_v25 }
 0x8c0   :  { %v179_v31 = vpop.xlane.xlu0 %178 }
 0x8c1   :  { %v180_v33 = vcvt.f32.s32 %v179_v31 }
 0x8c3   :  { %v183_v34 = vadd.s32 %v182_v32, %v180_v33 }
 0x8c5   :  { %vm184_vm3 = vcmp.eq.s32.totalorder %v394_v1, %v183_v34  ;;  %v190_v35 = vsel %vm189_vm14, %v183_v34, %v157_v15 }
 0x8c6   :  { %vm185_vm4 = vmand %vm184_vm3, %vm27_vm0 }
 0x8c7   :  { %vm507_vm5 = vmor %vm153_vm10, %vm185_vm4  ;;  %vm226_vm10 = vcmp.eq.f32.partialorder %v225_v50, 0.0  ;;  %vm259_vm4 = vcmp.eq.f32.partialorder %v258_v8, 0.0 }
 0x8c8   :  { %vm195_vm6 = vmor %vm507_vm5, %vm194_vm9 }
 0x8c9   :  { %v196_v37 = vsel %vm195_vm6, -1.0, %v192_v30  ;;  %vm227_vm12 = vmand %vm226_vm10, %vm27_vm0  ;;  %vm255_vm6 = vcmp.eq.s32.totalorder %v394_v1, 6 }
 0x8ca   :  { %v197_v38 = vsel %vm32_vm2, %v196_v37, -inf }
 0x8cb   :  { %198 = vmax.xlane.f32.xlu1 %v197_v38 }
 0x958   :  { %v514_v39 = vpop.xlane.xlu1 %198 }
 0x959   :  { %vm200_vm7 = vcmp.eq.f32.partialorder %v196_v37, %v514_v39  ;;  %v220_v26 = vmax.f32 %v514_v39, 0.0 }
 0x95a   :  { %v201_v40 = vsel %vm200_vm7, %v394_v1, 16 }
 0x95b   :  { %v202_v41 = vsel %vm32_vm2, %v201_v40, 2147483647  ;;  %v221_v29 = vadd.f32 %v220_v26, %v188_v27 }
 0x95c   :  { %v204_v42 = vshra.s32 %v202_v41, 16  ;;  %v203_v45 = vand.u32 65535, %v202_v41 }
 0x95e   :  { %v206_v44 = vcvt.s32.f32 %v204_v42  ;;  %v205_v47 = vcvt.s32.f32 %v203_v45 }
 0x960   :  { %207 = vmin.xlane.f32.xlu0 %v206_v44 }
 0x9ed   :  { %v208_v46 = vpop.xlane.xlu0 %207 }
 0x9ee   :  { %vm209_vm15 = vcmp.eq.f32.partialorder %v206_v44, %v208_v46  ;;  %v214_v49 = vcvt.f32.s32 %v208_v46 }
 0x9ef   :  { %v210_v48 = vsel %vm209_vm15, %v205_v47, inf  ;;  %vm260_vm15 = vmand %vm259_vm4, %vm27_vm0 }
 0x9f0   :  { %211 = vmin.xlane.f32.xlu1 %v210_v48  ;;  %v215_v52 = vshll.u32 %v214_v49, 16 }
 0xa7d   :  { %v212_v51 = vpop.xlane.xlu1 %211 }
 0xa7e   :  { %v213_v53 = vcvt.f32.s32 %v212_v51 }
 0xa80   :  { %v216_v54 = vadd.s32 %v215_v52, %v213_v53 }
 0xa82   :  { %vm217_vm11 = vcmp.eq.s32.totalorder %v394_v1, %v216_v54  ;;  %v223_v55 = vsel %vm222_vm8, %v216_v54, %v190_v35 }
 0xa83   :  { %vm525_vm13 = vmand %vm217_vm11, %vm27_vm0 }
 0xa84   :  { %vm219_vm14 = vmor %vm507_vm5, %vm525_vm13  ;;  %vm290_vm5 = vcmask 3072   ;;  %vm287_vm13 = vcmask 60416  }
 0xa85   :  { %vm228_vm1 = vmor %vm219_vm14, %vm227_vm12 }
 0xa86   :  { %v229_v57 = vsel %vm228_vm1, -1.0, %v225_v50 }
 0xa87   :  { %v230_v58 = vsel %vm32_vm2, %v229_v57, -inf }
 0xa88   :  { %231 = vmax.xlane.f32.xlu0 %v230_v58 }
 0xb15   :  { %v232_v59 = vpop.xlane.xlu0 %231 }
 0xb16   :  { %vm233_vm3 = vcmp.eq.f32.partialorder %v229_v57, %v232_v59  ;;  %v253_v28 = vmax.f32 %v232_v59, 0.0 }
 0xb17   :  { %v234_v60 = vsel %vm233_vm3, %v394_v1, 16 }
 0xb18   :  { %v235_v61 = vsel %vm32_vm2, %v234_v60, 2147483647  ;;  %v254_v31 = vadd.f32 %v253_v28, %v221_v29 }
 0xb19   :  { %v237_v63 = vshra.s32 %v235_v61, 16  ;;  %v236_v2 = vand.u32 65535, %v235_v61 }
 0xb1b   :  { %v239_v0 = vcvt.s32.f32 %v237_v63  ;;  %v238_v4 = vcvt.s32.f32 %v236_v2 }
 0xb1d   :  { %240 = vmin.xlane.f32.xlu1 %v239_v0 }
 0xbaa   :  { %v241_v3 = vpop.xlane.xlu1 %240 }
 0xbab   :  { %vm242_vm9 = vcmp.eq.f32.partialorder %v239_v0, %v241_v3  ;;  %v247_v7 = vcvt.f32.s32 %v241_v3 }
 0xbac   :  { %v243_v6 = vsel %vm242_vm9, %v238_v4, inf }
 0xbad   :  { %244 = vmin.xlane.f32.xlu0 %v243_v6  ;;  %v248_v10 = vshll.u32 %v247_v7, 16 }
 0xc3a   :  { %v245_v9 = vpop.xlane.xlu0 %244 }
 0xc3b   :  { %v246_v11 = vcvt.f32.s32 %v245_v9 }
 0xc3d   :  { %v249_v12 = vadd.s32 %v248_v10, %v246_v11 }
 0xc3f   :  { %vm250_vm7 = vcmp.eq.s32.totalorder %v394_v1, %v249_v12  ;;  %v256_v13 = vsel %vm255_vm6, %v249_v12, %v223_v55 }
 0xc40   :  { %vm251_vm8 = vmand %vm250_vm7, %vm27_vm0 }
 0xc41   :  { %vm252_vm10 = vmor %vm219_vm14, %vm251_vm8 }
 0xc42   :  { %vm261_vm11 = vmor %vm252_vm10, %vm260_vm15 }
 0xc43   :  { %v262_v14 = vsel %vm261_vm11, -1.0, %v258_v8 }
 0xc44   :  { %v263_v15 = vsel %vm32_vm2, %v262_v14, -inf }
 0xc45   :  { %264 = vmax.xlane.f32.xlu1 %v263_v15 }
 0xcd2   :  { %v265_v30 = vpop.xlane.xlu1 %264 }
 0xcd3   :  { %vm266_vm0 = vcmp.eq.f32.partialorder %v262_v14, %v265_v30  ;;  %v283_v23 = vmax.f32 %v265_v30, 0.0 }
 0xcd4   :  { %v267_v5 = vsel %vm266_vm0, %v394_v1, 16 }
 0xcd5   :  { %v284_v32 = vadd.f32 %v283_v23, %v254_v31  ;;  %v268_v43 = vsel %vm32_vm2, %v267_v5, 2147483647  ;;  %vm285_vm2 = vcmp.eq.s32.totalorder %v394_v1, 7 }
 0xcd6   :  { %v270_v62 = vshra.s32 %v268_v43, 16  ;;  %v269_v19 = vand.u32 65535, %v268_v43 }
 0xcd7   :  { %v289_v33 = vsub.f32 0.0, %v284_v32 }
 0xcd8   :  { %v272_v34 = vcvt.s32.f32 %v270_v62  ;;  %v271_v36 = vcvt.s32.f32 %v269_v19 }
 0xcd9   :  { %291 = vst.msk [vmem:[%s579_s2] sm:$0xf] %vm290_vm5, %v289_v33  ;;  %s337_s2 = scalar_lea.vmem %s299_s25, 64 }
 0xcda   :  { %273 = vmin.xlane.f32.xlu0 %v272_v34  ;;  %p338_p8 = scmp.ne.s32.totalorder %s299_s25, %s337_s2  ;;  %p343_p10 = scmp.lt.s32.totalorder %s337_s2, %s337_s2 }
 0xcdc   :  { %p344_p11 = por %p343_p10, %p342_p9 }
 0xcde   :  { %p345_p12 = pnand %p344_p11, %p338_p8 }
 0xd67   :  { %v274_v35 = vpop.xlane.xlu0 %273 }
 0xd68   :  { %vm275_vm12 = vcmp.eq.f32.partialorder %v272_v34, %v274_v35  ;;  %v280_v38 = vcvt.f32.s32 %v274_v35 }
 0xd69   :  { %v276_v37 = vsel %vm275_vm12, %v271_v36, inf }
 0xd6a   :  { %277 = vmin.xlane.f32.xlu1 %v276_v37  ;;  %v281_v40 = vshll.u32 %v280_v38, 16 }
 0xdf7   :  { %v278_v39 = vpop.xlane.xlu1 %277 }
 0xdf8   :  { %v279_v41 = vcvt.f32.s32 %v278_v39 }
 0xdfa   :  { %v282_v42 = vadd.s32 %v281_v40, %v279_v41 }
 0xdfc   :  { %v286_v44 = vsel %vm285_vm2, %v282_v42, %v256_v13 }
 0xdfd   :  { %288 = vst.msk [vmem:[#allocation5] sm:$0xf] %vm287_vm13, %v286_v44 }
 0xdfe   :  { %348 = shalt.err (!%p345_p12)
}
 0xdff   :  { %s349_s28 = scalar_lea.hbm %s578_s1, 64 }
 0xe00   :  { %p350_p13 = scmp.ne.s32.totalorder %s578_s1, %s349_s28  ;;  %p353_p0 = scmp.lt.u32.totalorder %s349_s28, %s578_s1 }
 0xe02   :  { %p355_p1 = pnand %p353_p0, %p350_p13 }
 0xe04   :  { %358 = shalt.err (!%p355_p1)
}
 0xe05   :  { %301 = dma.vmem_to_hbm [thread:$0]  %s299_s25, 64, %s578_s1, [#allocation4]  }
 0xe06   :  { %361 = dma.done.wait [#allocation4], 64  }
 0xe07   :  { %362 = vsyncadd [#allocation4], 4294967232 }
 0xe08   :  { %309 = vsyncpa [#allocation3], 1 }
 0xe09   :  { %310 = vsyncpa [#allocation4], 1 }

</bundles_post_ra>
